<compile_context>
chip_gen: v7x
topology: tpu7x:2x2x1
jax: 0.10.0
libtpu: 0.0.40
codegen_flags: <defaults>
</compile_context>

<pallas_src>
import jax
import jax.numpy as jnp
from jax.experimental import pallas as pl
from jax.experimental.pallas import tpu as pltpu

INPUT_NUM = 100
HIDDEN_NUM = 64
OUTPUT_NUM = 2

HID_PAD = 128   # hidden padded to lane width -> lane-dense activations
OUT_COLS = 8    # minimum legal output width (block last dim == full array dim)


def _round_up(n, m):
    return ((n + m - 1) // m) * m


def _select_tb(batch, tb_req):
    """Pick a batch-tile size: big tiles for DMA efficiency, >=2 grid steps on large batches."""
    tb = max(8, min(int(tb_req), 4096))
    tb = (tb // 8) * 8                       # sublane-aligned
    b_ceil = _round_up(batch, 8)
    tb = min(tb, b_ceil)
    # v7x megacore: "parallel" only helps if there are >=2 grid steps to shard across the 2 TCs.
    if b_ceil >= 256 and pl.cdiv(b_ceil, tb) < 2:
        tb = _round_up((b_ceil + 1) // 2, 8)
    return tb


def net_kernel(x_ref, w1_ref, b1_ref, w2_ref, b2_ref, o_ref):
    # x_ref:  [tb, 100]  f32  (ragged-edge rows hold unspecified values; discarded downstream)
    # w1_ref: [100, 128] bf16   b1_ref: [1, 128] f32
    # w2_ref: [128, 8]   f32    b2_ref: [1, 8]   f32
    # o_ref:  [tb, 8]    f32  logits (softmax over the batch axis happens in the wrapper)
    x_bf16 = x_ref[...].astype(jnp.bfloat16)          # VPU cast, hidden under DMA
    h = jnp.dot(x_bf16, w1_ref[...], preferred_element_type=jnp.float32)
    h = jnp.maximum(h + b1_ref[...], 0.0)
    logits = jnp.dot(h, w2_ref[...], preferred_element_type=jnp.float32) + b2_ref[...]
    o_ref[...] = logits


def prepare_params(w1, b1, w2, b2):
    """Pad weights to kernel layouts (done once). fc1 bf16, fc2 f32; weights are [in, out]."""
    w1p = jnp.zeros((INPUT_NUM, HID_PAD), jnp.bfloat16)
    w1p = w1p.at[:, :HIDDEN_NUM].set(w1.astype(jnp.bfloat16))
    b1p = jnp.zeros((1, HID_PAD), jnp.float32)
    b1p = b1p.at[:, :HIDDEN_NUM].set(b1.reshape(1, HIDDEN_NUM).astype(jnp.float32))
    w2p = jnp.zeros((HID_PAD, OUT_COLS), jnp.float32)
    w2p = w2p.at[:HIDDEN_NUM, :OUTPUT_NUM].set(w2.astype(jnp.float32))
    b2p = jnp.zeros((1, OUT_COLS), jnp.float32)
    b2p = b2p.at[:, :OUTPUT_NUM].set(b2.reshape(1, OUTPUT_NUM).astype(jnp.float32))
    return w1p, b1p, w2p, b2p


def net_forward(x, padded_params, *, tb=2048):
    """x: [B, INPUT_NUM] float32. Returns softmax(fc2(relu(fc1(x))), dim=0): [B, OUTPUT_NUM]."""
    w1p, b1p, w2p, b2p = padded_params
    B = x.shape[0]
    tb = _select_tb(B, tb)
    steps = pl.cdiv(B, tb)

    flops = 2 * B * (INPUT_NUM * HIDDEN_NUM + HIDDEN_NUM * OUTPUT_NUM)
    bytes_accessed = (B * INPUT_NUM * 4                 # x read (f32, unpadded)
                      + INPUT_NUM * HID_PAD * 2         # w1 (bf16)
                      + HID_PAD * 4                     # b1
                      + HID_PAD * OUT_COLS * 4          # w2
                      + OUT_COLS * 4                    # b2
                      + B * OUT_COLS * 4)               # logits write

    logits = pl.pallas_call(
        net_kernel,
        out_shape=jax.ShapeDtypeStruct((B, OUT_COLS), jnp.float32),
        grid_spec=pltpu.PrefetchScalarGridSpec(
            num_scalar_prefetch=0,
            grid=(steps,),
            in_specs=[
                pl.BlockSpec((tb, INPUT_NUM), lambda i: (i, 0)),      # x: batch-tiled, raw f32
                pl.BlockSpec((INPUT_NUM, HID_PAD), lambda i: (0, 0)),  # w1: VMEM-resident
                pl.BlockSpec((1, HID_PAD), lambda i: (0, 0)),          # b1: resident
                pl.BlockSpec((HID_PAD, OUT_COLS), lambda i: (0, 0)),   # w2: resident
                pl.BlockSpec((1, OUT_COLS), lambda i: (0, 0)),         # b2: resident
            ],
            out_specs=pl.BlockSpec((tb, OUT_COLS), lambda i: (i, 0)),
        ),
        compiler_params=pltpu.CompilerParams(
            dimension_semantics=("parallel",),            # independent batch tiles (2 TCs on v7x)
            vmem_limit_bytes=32 * 1024 * 1024,            # double-buffered tiles need only ~2 MiB
        ),
        cost_estimate=pl.CostEstimate(
            flops=int(flops), transcendentals=0, bytes_accessed=int(bytes_accessed)),
    )(x, w1p, b1p, w2p, b2p)

    # Drop the padded output columns, then softmax over dim=0 (batch axis) as in the PyTorch code.
    logits = logits[:, :OUTPUT_NUM]
    return jax.nn.softmax(logits, axis=0)


def init_params(key):
    # Deterministic init mimicking nn.Linear's uniform(-1/sqrt(fan_in), 1/sqrt(fan_in)).
    # Weights stored pre-transposed as [in, out] so the kernel computes x @ W.
    k1, k2, k3, k4 = jax.random.split(key, 4)
    bound1 = 1.0 / jnp.sqrt(INPUT_NUM)
    bound2 = 1.0 / jnp.sqrt(HIDDEN_NUM)
    w1 = jax.random.uniform(k1, (INPUT_NUM, HIDDEN_NUM), jnp.float32, -bound1, bound1)
    b1 = jax.random.uniform(k2, (HIDDEN_NUM,), jnp.float32, -bound1, bound1)
    w2 = jax.random.uniform(k3, (HIDDEN_NUM, OUTPUT_NUM), jnp.float32, -bound2, bound2)
    b2 = jax.random.uniform(k4, (OUTPUT_NUM,), jnp.float32, -bound2, bound2)
    return w1, b1, w2, b2


def reference_forward(x, w1, b1, w2, b2):
    # Same numerics as the kernel: bf16 inputs / f32 accumulation for fc1, full f32 for fc2.
    h = jnp.dot(x.astype(jnp.bfloat16), w1.astype(jnp.bfloat16),
                preferred_element_type=jnp.float32) + b1[None, :]
    h = jnp.maximum(h, 0.0)
    logits = jnp.dot(h, w2, preferred_element_type=jnp.float32) + b2[None, :]
    return jax.nn.softmax(logits, axis=0)


if __name__ == "__main__":
    key = jax.random.PRNGKey(0)
    kx1, kx2, kx3, kp = jax.random.split(key, 4)

    w1, b1, w2, b2 = init_params(kp)
    padded = prepare_params(w1, b1, w2, b2)

    # Case 1: small batch, single grid step.
    B1 = 16
    x1 = jax.random.normal(kx1, (B1, INPUT_NUM), dtype=jnp.float32)
    out1 = jax.block_until_ready(net_forward(x1, padded))
    ref1 = reference_forward(x1, w1, b1, w2, b2)
    assert out1.shape == (B1, OUTPUT_NUM)
    assert jnp.allclose(out1, ref1, atol=2e-4, rtol=2e-3)
    # Softmax over the batch axis: each column sums to 1.
    assert jnp.allclose(out1.sum(axis=0), jnp.ones((OUTPUT_NUM,)), atol=1e-5)

    # Case 2: batch not a tile multiple, multi-step grid with a ragged last tile.
    B2 = 20
    x2 = jax.random.normal(kx2, (B2, INPUT_NUM), dtype=jnp.float32)
    out2 = jax.block_until_ready(net_forward(x2, padded, tb=8))
    ref2 = reference_forward(x2, w1, b1, w2, b2)
    assert out2.shape == (B2, OUTPUT_NUM)
    assert jnp.allclose(out2, ref2, atol=2e-4, rtol=2e-3)

    # Case 3: default tile selection splits a larger batch into >=2 steps (megacore path).
    B3 = 300
    x3 = jax.random.normal(kx3, (B3, INPUT_NUM), dtype=jnp.float32)
    out3 = jax.block_until_ready(net_forward(x3, padded))
    ref3 = reference_forward(x3, w1, b1, w2, b2)
    assert out3.shape == (B3, OUTPUT_NUM)
    assert jnp.allclose(out3, ref3, atol=2e-4, rtol=2e-3)
    assert jnp.allclose(out3.sum(axis=0), jnp.ones((OUTPUT_NUM,)), atol=1e-5)

    print("KERNEL_OK")
</pallas_src>

<mosaic_0001>
module attributes {stable_mosaic.version = 11 : i64} {
  func.func @net_kernel(%arg0: i32, %arg1: memref<16x100xf32, #tpu.memory_space<vmem>>, %arg2: memref<100x128xbf16, #tpu.memory_space<vmem>>, %arg3: memref<1x128xf32, #tpu.memory_space<vmem>>, %arg4: memref<128x8xf32, #tpu.memory_space<vmem>>, %arg5: memref<1x8xf32, #tpu.memory_space<vmem>>, %arg6: memref<16x8xf32, #tpu.memory_space<vmem>>) attributes {dimension_semantics = [#tpu.dimension_semantics<parallel>], iteration_bounds = array<i64: 1>, scalar_prefetch = 0 : i64, scratch_operands = 0 : i64, tpu.core_type = #tpu.core_type<tc>, window_params = [{transform_indices = @transform_0, window_bounds = array<i64: 16, 100>}, {pipeline_mode = #tpu.pipeline_mode<synchronous>, transform_indices = @transform_1, window_bounds = array<i64: 100, 128>}, {pipeline_mode = #tpu.pipeline_mode<synchronous>, transform_indices = @transform_2, window_bounds = array<i64: 1, 128>}, {pipeline_mode = #tpu.pipeline_mode<synchronous>, transform_indices = @transform_3, window_bounds = array<i64: 128, 8>}, {pipeline_mode = #tpu.pipeline_mode<synchronous>, transform_indices = @transform_4, window_bounds = array<i64: 1, 8>}, {transform_indices = @transform_5, window_bounds = array<i64: 16, 8>}]} {
    %c0 = arith.constant 0 : index
    %c0_0 = arith.constant 0 : index
    %0 = vector.load %arg1[%c0, %c0_0] : memref<16x100xf32, #tpu.memory_space<vmem>>, vector<16x100xf32>
    %1 = arith.truncf %0 : vector<16x100xf32> to vector<16x100xbf16>
    %c0_1 = arith.constant 0 : index
    %c0_2 = arith.constant 0 : index
    %2 = vector.load %arg2[%c0_1, %c0_2] : memref<100x128xbf16, #tpu.memory_space<vmem>>, vector<100x128xbf16>
    %cst = arith.constant dense<0.000000e+00> : vector<16x128xf32>
    %3 = tpu.matmul %1, %2, %cst {dimension_numbers = #tpu.dot_dimension_numbers<[1], [0], [0], [1], [0, 0, 1, 1], [], []>} : vector<16x100xbf16>, vector<100x128xbf16>, vector<16x128xf32> -> vector<16x128xf32>
    %c0_3 = arith.constant 0 : index
    %c0_4 = arith.constant 0 : index
    %4 = vector.load %arg3[%c0_3, %c0_4] : memref<1x128xf32, #tpu.memory_space<vmem>>, vector<1x128xf32>
    %5 = vector.broadcast %4 : vector<1x128xf32> to vector<16x128xf32>
    %6 = arith.addf %3, %5 : vector<16x128xf32>
    %cst_5 = arith.constant 0.000000e+00 : f32
    %7 = vector.broadcast %cst_5 : f32 to vector<16x128xf32>
    %8 = arith.maximumf %6, %7 : vector<16x128xf32>
    %c0_6 = arith.constant 0 : index
    %c0_7 = arith.constant 0 : index
    %9 = vector.load %arg4[%c0_6, %c0_7] : memref<128x8xf32, #tpu.memory_space<vmem>>, vector<128x8xf32>
    %cst_8 = arith.constant dense<0.000000e+00> : vector<16x8xf32>
    %10 = tpu.matmul %8, %9, %cst_8 {dimension_numbers = #tpu.dot_dimension_numbers<[1], [0], [0], [1], [0, 0, 1, 1], [], []>} : vector<16x128xf32>, vector<128x8xf32>, vector<16x8xf32> -> vector<16x8xf32>
    %c0_9 = arith.constant 0 : index
    %c0_10 = arith.constant 0 : index
    %11 = vector.load %arg5[%c0_9, %c0_10] : memref<1x8xf32, #tpu.memory_space<vmem>>, vector<1x8xf32>
    %12 = vector.broadcast %11 : vector<1x8xf32> to vector<16x8xf32>
    %13 = arith.addf %10, %12 : vector<16x8xf32>
    %c0_11 = arith.constant 0 : index
    %c0_12 = arith.constant 0 : index
    %14 = vector.load %arg6[%c0_11, %c0_12] : memref<16x8xf32, #tpu.memory_space<vmem>>, vector<16x8xf32>
    tpu.vector_store %arg6[%c0_11, %c0_12], %13 {strides = array<i32>} : memref<16x8xf32, #tpu.memory_space<vmem>>, vector<16x8xf32>,
    return
  }
  func.func @transform_0(%arg0: i32) -> (i32, i32) {
    %c0_i32 = arith.constant 0 : i32
    %c0_i32_0 = arith.constant 0 : i32
    return %arg0, %c0_i32 : i32, i32
  }
  func.func @transform_1(%arg0: i32) -> (i32, i32) {
    %c0_i32 = arith.constant 0 : i32
    %c0_i32_0 = arith.constant 0 : i32
    %c0_i32_1 = arith.constant 0 : i32
    return %c0_i32, %c0_i32_0 : i32, i32
  }
  func.func @transform_2(%arg0: i32) -> (i32, i32) {
    %c0_i32 = arith.constant 0 : i32
    %c0_i32_0 = arith.constant 0 : i32
    %c0_i32_1 = arith.constant 0 : i32
    return %c0_i32, %c0_i32_0 : i32, i32
  }
  func.func @transform_3(%arg0: i32) -> (i32, i32) {
    %c0_i32 = arith.constant 0 : i32
    %c0_i32_0 = arith.constant 0 : i32
    %c0_i32_1 = arith.constant 0 : i32
    return %c0_i32, %c0_i32_0 : i32, i32
  }
  func.func @transform_4(%arg0: i32) -> (i32, i32) {
    %c0_i32 = arith.constant 0 : i32
    %c0_i32_0 = arith.constant 0 : i32
    %c0_i32_1 = arith.constant 0 : i32
    return %c0_i32, %c0_i32_0 : i32, i32
  }
  func.func @transform_5(%arg0: i32) -> (i32, i32) {
    %c0_i32 = arith.constant 0 : i32
    %c0_i32_0 = arith.constant 0 : i32
    return %arg0, %c0_i32 : i32, i32
  }
}

</mosaic_0001>

<bundles_post_ra>
// kernel: tpu_custom_call.1
= control target key start
LH: loop header
LB: loop body
LE: loop exit
PB: predicated region body
PF: predicated region fallthrough
CT: control target
= control target key end

     0   :  { %v369_v0 = vmov 0.0   ;;  %vm370_vm0 = vmmov 0   ;;  %vm87_vm1 = vcmask 1041408   ;;  %vm83_vm2 = vcmask 818176   ;;  %s488_s1 = inlined_call_operand.vmem [shape: bf16[100,128], index: 1, kind: input, shape index: {}]   ;;  %s489_s3 = inlined_call_operand.vmem [shape: f32[128,8], index: 3, kind: input, shape index: {}]   ;;  %s490_s0 = inlined_call_operand.vmem [shape: f32[16,100], index: 0, kind: input, shape index: {}]   ;;  %s491_s2 = inlined_call_operand.vmem [shape: f32[1,128], index: 2, kind: input, shape index: {}]   ;;  %s492_s4 = inlined_call_operand.vmem [shape: f32[1,8], index: 4, kind: input, shape index: {}]   ;;  %s493_s5 = inlined_call_operand.vmem [shape: f32[16,8], index: 5, kind: output, shape index: {}]  }
   0x1   :  { %275 = vmatprep.subr.bf16.mxu0 %v369_v0  ;;  %v362_v1 = vld [vmem:[%s488_s1] sm:$0xff]   ;;  %289 = vmatprep.mubr.msk.bf16.mxu0 %vm370_vm0, %v369_v0  ;;  %v363_v2 = vld [vmem:[%s488_s1 + $0x8] sm:$0xff]   ;;  %v364_v3 = vld [vmem:[%s488_s1 + $0x10] sm:$0xff]   ;;  %vm232_vm3 = vcmask 64512  }
   0x2   :  { %276 = vmatpush3.bf16.msra.mxu0 %v362_v1  ;;  %v134_v4 = vld [vmem:[%s489_s3] sm:$0xff]  ;;  %v135_v5 = vld [vmem:[%s489_s3 + $0x8] sm:$0xff]  ;;  %v136_v7 = vld [vmem:[%s489_s3 + $0x10] sm:$0xff] }
   0x3   :  { %277 = vmatprep.subr.bf16.mxu0 %v369_v0  ;;  %v328_v6 = vpack.c.bf16 %v135_v5, %v134_v4  ;;  %v137_v8 = vld [vmem:[%s489_s3 + $0x18] sm:$0xff]  ;;  %v138_v10 = vld [vmem:[%s489_s3 + $0x20] sm:$0xff]  ;;  %v139_v11 = vld [vmem:[%s489_s3 + $0x28] sm:$0xff] }
   0x4   :  { %v332_v9 = vpack.c.bf16 %v137_v8, %v136_v7  ;;  %v365_v12 = vld [vmem:[%s488_s1 + $0x18] sm:$0xff]   ;;  %v336_v13 = vpack.c.bf16 %v139_v11, %v138_v10  ;;  %v140_v14 = vld [vmem:[%s489_s3 + $0x30] sm:$0xff]  ;;  %v366_v16 = vld [vmem:[%s488_s1 + $0x20] sm:$0xff]  }
   0x5   :  { %329 = vmatprep.subr.bf16.mxu1 %v328_v6  ;;  %v141_v15 = vld [vmem:[%s489_s3 + $0x38] sm:$0xff]  ;;  %v142_v18 = vld [vmem:[%s489_s3 + $0x40] sm:$0xff]  ;;  %v143_v19 = vld [vmem:[%s489_s3 + $0x48] sm:$0xff] }
   0x6   :  { %278 = vmatpush3.bf16.msra.mxu0 %v363_v2  ;;  %331 = vmatpush3.bf16.msra.mxu1 %v328_v6  ;;  %v340_v17 = vpack.c.bf16 %v141_v15, %v140_v14  ;;  %v367_v20 = vld [vmem:[%s488_s1 + $0x28] sm:$0xff]   ;;  %v368_v21 = vld [vmem:[%s488_s1 + $0x30] ss:$0 sps:$4 sm:$0x33]   ;;  %v344_v22 = vpack.c.bf16 %v143_v19, %v142_v18  ;;  %v145_v24 = vld [vmem:[%s489_s3 + $0x58] sm:$0xff] }
   0x7   :  { %279 = vmatprep.subr.bf16.mxu0 %v369_v0  ;;  %333 = vmatprep.subr.bf16.mxu1 %v332_v9  ;;  %v144_v23 = vld [vmem:[%s489_s3 + $0x50] sm:$0xff]  ;;  %v21_v25 = vld [vmem:[%s490_s0] sm:$0xff]  ;;  %v22_v26 = vld [vmem:[%s490_s0 + $0x8] sm:$0xff]  ;;  %v89_v27 = vsel %vm87_vm1, %v368_v21, 0 }
   0x8   :  { %v348_v28 = vpack.c.bf16 %v145_v24, %v144_v23  ;;  %v23_v29 = vpack.c.bf16 %v22_v26, %v21_v25  ;;  %v146_v30 = vld [vmem:[%s489_s3 + $0x60] sm:$0xff]  ;;  %v147_v31 = vld [vmem:[%s489_s3 + $0x68] sm:$0xff]  ;;  %v148_v33 = vld [vmem:[%s489_s3 + $0x70] sm:$0xff] }
   0x9   :  { %v352_v32 = vpack.c.bf16 %v147_v31, %v146_v30  ;;  %v149_v34 = vld [vmem:[%s489_s3 + $0x78] sm:$0xff]  ;;  %v239_v36 = vld [vmem:[%s491_s2] ss:$0 sm:$0xff] }
   0xa   :  { %280 = vmatpush3.bf16.msra.mxu0 %v364_v3  ;;  %335 = vmatpush3.bf16.msra.mxu1 %v332_v9  ;;  %v356_v35 = vpack.c.bf16 %v149_v34, %v148_v33  ;;  %v248_v45 = vld [vmem:[%s492_s4] ss:$0 sm:$0xff] }
   0xb   :  { %281 = vmatprep.subr.bf16.mxu0 %v369_v0  ;;  %337 = vmatprep.subr.bf16.mxu1 %v336_v13 }
   0xe   :  { %282 = vmatpush3.bf16.msra.mxu0 %v365_v12  ;;  %339 = vmatpush3.bf16.msra.mxu1 %v336_v13 }
   0xf   :  { %283 = vmatprep.subr.bf16.mxu0 %v369_v0  ;;  %341 = vmatprep.subr.bf16.mxu1 %v340_v17 }
  0x12   :  { %284 = vmatpush3.bf16.msra.mxu0 %v366_v16  ;;  %343 = vmatpush3.bf16.msra.mxu1 %v340_v17 }
  0x13   :  { %285 = vmatprep.subr.bf16.mxu0 %v369_v0  ;;  %345 = vmatprep.subr.bf16.mxu1 %v344_v22 }
  0x16   :  { %286 = vmatpush3.bf16.msra.mxu0 %v367_v20  ;;  %347 = vmatpush3.bf16.msra.mxu1 %v344_v22 }
  0x17   :  { %287 = vmatprep.subr.bf16.mxu0 %v369_v0  ;;  %349 = vmatprep.subr.bf16.mxu1 %v348_v28 }
  0x1a   :  { %288 = vmatpush3.bf16.msra.mxu0 %v89_v27  ;;  %351 = vmatpush3.bf16.msra.mxu1 %v348_v28 }
  0x1b   :  { %353 = vmatprep.subr.bf16.mxu1 %v352_v32 }
  0x1d   :  { %290 = vmatmul.mubr.msk.bf16.vlgmr.msra.gmra.mrb[0].mxu0 %vm83_vm2, %v23_v29 }
  0x1e   :  { %355 = vmatpush3.bf16.msra.mxu1 %v352_v32 }
  0x1f   :  { %357 = vmatprep.subr.bf16.mxu1 %v356_v35 }
  0x22   :  { %359 = vmatpush3.bf16.msra.mxu1 %v356_v35 }
  0xf0   :  { %v125_v37 = vpop.f32.mrb[0].mxu0 }
  0xf1   :  { %v291_v38 = vpop.f32.mrb[1].mxu0  ;;  %v126_v39 = vadd.f32 %v239_v36, %v125_v37 }
  0xf2   :  { %v128_v40 = vpop.f32.mrb[2].mxu0 }
  0xf3   :  { %v129_v41 = vadd.f32 %v239_v36, %v128_v40  ;;  %v292_v42 = vpop.f32.mrb[3].mxu0  ;;  %v132_v43 = vmax.f32 %v126_v39, 0.0 }
  0xf5   :  { %v133_v44 = vmax.f32 %v129_v41, 0.0  ;;  %325 = vmatprep.mubr.f32.mxu1 %v132_v43 }
  0xf7   :  { %326 = vmatmul.mubr.f32.vlgmr.msra.gmra.mrb[0].mxu1 %v133_v44 }
 0x1ca   :  { %v327_v46 = vpop.f32.mrb[0].mxu1 }
 0x1cb   :  { %v229_v47 = vadd.f32 %v327_v46, %v248_v45  ;;  %v223_v48 = vpop.f32.mrb[1].mxu1 }
 0x1cc   :  { %v224_v49 = vadd.f32 %v248_v45, %v223_v48 }
 0x1cd   :  { %234 = vst.msk [vmem:[%s493_s5 + $0x8] sm:$0xff] %vm232_vm3, %v229_v47 }
 0x1ce   :  { %233 = vst.msk [vmem:[%s493_s5] sm:$0xff] %vm232_vm3, %v224_v49 }

</bundles_post_ra>
